<compile_context>
chip_gen: v7x
topology: tpu7x:2x2x1
jax: 0.10.0
libtpu: 0.0.40
codegen_flags: <defaults>
</compile_context>

<pallas_src>
import numpy as np
import jax
import jax.numpy as jnp
from jax.experimental import pallas as pl
from jax.experimental.pallas import tpu as pltpu


# -------------------------------------------------------------------------
# Irreps bookkeeping (glue, plain python/numpy).  Irrep = (l, parity).
# -------------------------------------------------------------------------
IRREPS_IN1 = [(2, (0, 1)), (2, (1, -1))]               # "2x0e + 2x1o"
IRREPS_IN2 = [(1, (0, 1)), (1, (1, -1))]               # "1x0e + 1x1o"
IRREPS_OUT = [(3, (0, 1)), (3, (1, -1)), (2, (1, 1))]  # "3x0e + 3x1o + 2x1e"


def ir_dim(ir):
    return 2 * ir[0] + 1


def irreps_dim(irreps):
    return sum(mul * ir_dim(ir) for mul, ir in irreps)


def irreps_slices(irreps):
    out, off = [], 0
    for mul, ir in irreps:
        d = mul * ir_dim(ir)
        out.append(slice(off, off + d))
        off += d
    return out


def ir_in_product(ir3, ir1, ir2):
    """ir3 in ir1 * ir2  (selection rule)."""
    l1, p1 = ir1
    l2, p2 = ir2
    l3, p3 = ir3
    return (p3 == p1 * p2) and (abs(l1 - l2) <= l3 <= l1 + l2)


def wigner_3j(l1, l2, l3):
    """Real-basis 3j symbols, e3nn convention, tabulated for l <= 1.

    Each path's 3j tensor is unique up to a global sign (e3nn fixes one
    convention); with random external weights the sign is unobservable.
    """
    # TODO(synk): general-l wigner_3j (complex CG + real-basis change) not
    # implemented in-script; only l<=1 paths are tabulated.
    if (l1, l2, l3) == (0, 0, 0):
        return np.ones((1, 1, 1), np.float64)
    if (l1, l2, l3) == (0, 1, 1):
        return (np.eye(3) / np.sqrt(3.0))[None, :, :]
    if (l1, l2, l3) == (1, 0, 1):
        return (np.eye(3) / np.sqrt(3.0))[:, None, :]
    if (l1, l2, l3) == (1, 1, 0):
        return (np.eye(3) / np.sqrt(3.0))[:, :, None]
    if (l1, l2, l3) == (1, 1, 1):
        eps = np.zeros((3, 3, 3), np.float64)
        eps[0, 1, 2] = eps[1, 2, 0] = eps[2, 0, 1] = 1.0
        eps[0, 2, 1] = eps[2, 1, 0] = eps[1, 0, 2] = -1.0
        return eps / np.sqrt(6.0)
    raise NotImplementedError(f"wigner_3j({l1},{l2},{l3}) not tabulated")


def build_separate_weight_tp_params(seed=0):
    """Replicates SeparateWeightTensorProduct.__init__ + the weight fusion of
    forward():  weight[u,v,w] = W1[u,w] * W2[v,w]  per instruction, then folds
    everything (weights, 3j, e3nn path normalization) into M[a, b, o]."""
    key = jax.random.PRNGKey(seed)
    instructions, weights1, weights2 = [], [], []
    for i1, (mul1, ir1) in enumerate(IRREPS_IN1):
        for i2, (mul2, ir2) in enumerate(IRREPS_IN2):
            for io, (mulo, ir3) in enumerate(IRREPS_OUT):
                if ir_in_product(ir3, ir1, ir2):
                    key, k1, k2 = jax.random.split(key, 3)
                    weights1.append(np.asarray(
                        jax.random.normal(k1, (mul1, mulo), jnp.float32), np.float64))
                    weights2.append(np.asarray(
                        jax.random.normal(k2, (mul2, mulo), jnp.float32), np.float64))
                    instructions.append((i1, i2, io))

    # e3nn normalization: irrep_normalization='component',
    # path_normalization='element', in/out variances = 1, path_weight = 1.
    def sqrt_alpha(io_target):
        num_el = sum(IRREPS_IN1[i1][0] * IRREPS_IN2[i2][0]
                     for (i1, i2, io) in instructions if io == io_target)
        alpha = ir_dim(IRREPS_OUT[io_target][1]) / num_el
        return np.sqrt(alpha)

    d1, d2, dout = irreps_dim(IRREPS_IN1), irreps_dim(IRREPS_IN2), irreps_dim(IRREPS_OUT)
    sl1, sl2, slo = irreps_slices(IRREPS_IN1), irreps_slices(IRREPS_IN2), irreps_slices(IRREPS_OUT)

    M = np.zeros((d1, d2, dout), np.float64)
    for (i1, i2, io), w1, w2 in zip(instructions, weights1, weights2):
        mul1, ir1 = IRREPS_IN1[i1]
        mul2, ir2 = IRREPS_IN2[i2]
        mulo, ir3 = IRREPS_OUT[io]
        C = wigner_3j(ir1[0], ir2[0], ir3[0])            # (di, dj, dk)
        W3 = w1[:, None, :] * w2[None, :, :]             # (mul1, mul2, mulo)
        blk = sqrt_alpha(io) * np.einsum('uvw,ijk->uivjwk', W3, C)
        blk = blk.reshape(mul1 * ir_dim(ir1), mul2 * ir_dim(ir2), mulo * ir_dim(ir3))
        M[sl1[i1], sl2[i2], slo[io]] += blk
    return jnp.asarray(M, jnp.float32)


# -------------------------------------------------------------------------
# Pallas kernel: tiled bilinear contraction  out = einsum('na,nb,abo->no'),
# run feature-major / lane-dense:  out^T = MT @ z  with
#   z[b*D1+a, n] = x1[a, n] * x2[b, n],   MT[o, b*D1+a] = M[a, b, o].
# -------------------------------------------------------------------------
def _tp_kernel(x1_ref, x2_ref, mt_ref, o_ref):
    # x1_ref: (D1, TN), x2_ref: (D2, TN), mt_ref: (DOUT, D2*D1), o_ref: (DOUT, TN)
    x1 = x1_ref[...]                          # (D1, TN) lane-dense vregs
    x2 = x2_ref[...]                          # (D2, TN)
    d2 = x2.shape[0]
    # Sublane-broadcast multiplies + sublane-aligned concat: no single-lane
    # slices, no lane concat, no 3-D (TN, D1, D2) intermediate.
    parts = [x1 * x2[b:b + 1, :] for b in range(d2)]
    z = jnp.concatenate(parts, axis=0)        # (D2*D1, TN)
    # Single MXU matmul per tile, f32 accumulation.
    out = jnp.dot(mt_ref[...], z, preferred_element_type=jnp.float32)
    o_ref[...] = out.astype(o_ref.dtype)      # unmasked lane-dense stores


def _round_up(x, m):
    return ((x + m - 1) // m) * m


def _vmem_capacity_bytes():
    try:
        return int(pltpu.get_tpu_info().vmem_capacity_bytes)
    except Exception:
        return 64 * 1024 * 1024               # v7x per-TC size: safe everywhere


def _default_tile_cols(d1, d2, dout, itemsize, vmem_cap):
    """Biggest lane-width (multiple of 128) whose per-step VMEM footprint
    (double-buffered x1/x2/out blocks + z/parts temporaries + f32 matmul
    result) stays well inside this chip's VMEM (64 MiB/TC on v7x, 128 MiB on
    v5e/v6e)."""
    per_col = (itemsize * 2 * (d1 + d2 + dout)          # double-buffered blocks
               + 4 * (2 * d1 * d2 + 2 * dout))          # z/parts + f32 result
    tile = (int(vmem_cap * 0.4) // per_col) // 128 * 128
    return int(max(128, min(tile, 65536)))


def separate_weight_tensor_product(x1, x2, M, *, tile_n=None):
    """out[n, o] = sum_{a,b} x1[n, a] * x2[n, b] * M[a, b, o]."""
    N, d1 = x1.shape
    n2, d2 = x2.shape
    assert n2 == N and x1.dtype == x2.dtype
    dout = M.shape[-1]
    assert M.shape == (d1, d2, dout)
    itemsize = jnp.dtype(x1.dtype).itemsize

    # MT[o, b*d1 + a] = M[a, b, o]  (matches the kernel's z row ordering).
    MT = jnp.transpose(M, (2, 1, 0)).reshape(dout, d2 * d1)

    # ---- batch tile (lane width): chip-aware, 128-aligned --------------------
    vmem_cap = _vmem_capacity_bytes()
    if tile_n is None:
        cap = _default_tile_cols(d1, d2, dout, itemsize, vmem_cap)
    else:
        cap = max(128, _round_up(int(tile_n), 128))
    n_blocks = max(1, -(-N // cap))
    # With >= ~1 MB of real bytes per step already, prefer >= 8 grid steps so
    # v7x's two TensorCores load-balance (harmless extra steps on 1-TC chips).
    if N >= 8 * 8192 and n_blocks < 8:
        n_blocks = 8
    tile = _round_up(-(-N // n_blocks), 128)
    n_padded = tile * n_blocks

    # ---- feature-major views (one copy each; for peak perf keep activations
    # feature-major upstream and call the pallas_call directly) ---------------
    x1t = jnp.transpose(x1)                   # (d1, N)
    x2t = jnp.transpose(x2)                   # (d2, N)
    if n_padded != N:
        pad = ((0, 0), (0, n_padded - N))     # tail-only zero columns
        x1t = jnp.pad(x1t, pad)
        x2t = jnp.pad(x2t, pad)

    vmem_limit = int(min(vmem_cap * 0.7, vmem_cap - (8 << 20)))
    out_t = pl.pallas_call(
        _tp_kernel,
        out_shape=jax.ShapeDtypeStruct((dout, n_padded), x1.dtype),
        grid_spec=pltpu.PrefetchScalarGridSpec(
            num_scalar_prefetch=0,
            grid=(n_blocks,),
            in_specs=[
                pl.BlockSpec((d1, tile), lambda i: (0, i)),
                pl.BlockSpec((d2, tile), lambda i: (0, i)),
                # Constant block index -> MT stays resident in VMEM (no re-DMA).
                pl.BlockSpec((dout, d2 * d1), lambda i: (0, 0)),
            ],
            out_specs=pl.BlockSpec((dout, tile), lambda i: (0, i)),
        ),
        compiler_params=pltpu.CompilerParams(
            dimension_semantics=("parallel",),
            vmem_limit_bytes=vmem_limit,
        ),
    )(x1t, x2t, MT)
    # Back to batch-major (N, dout); padded columns (zeros) are dropped.
    return jnp.transpose(out_t[:, :N])


if __name__ == "__main__":
    D1 = irreps_dim(IRREPS_IN1)    # 8
    D2 = irreps_dim(IRREPS_IN2)    # 4
    DOUT = irreps_dim(IRREPS_OUT)  # 18
    N = 64                         # e.g. number of edges (small demo shape)

    M = build_separate_weight_tp_params(seed=0)

    kx1, kx2 = jax.random.split(jax.random.PRNGKey(0))
    x1 = jax.random.normal(kx1, (N, D1), jnp.float32)
    x2 = jax.random.normal(kx2, (N, D2), jnp.float32)

    out = separate_weight_tensor_product(x1, x2, M)
    out = jax.block_until_ready(out)

    # High-precision reference of the same fused bilinear map.
    ref = np.einsum('na,nb,abo->no',
                    np.asarray(x1, np.float64),
                    np.asarray(x2, np.float64),
                    np.asarray(M, np.float64))
    assert out.shape == (N, DOUT)
    np.testing.assert_allclose(np.asarray(out, np.float64), ref,
                               rtol=1e-4, atol=1e-4)

    print("KERNEL_OK")
</pallas_src>

<mosaic_0001>
module attributes {stable_mosaic.version = 11 : i64} {
  func.func @_tp_kernel(%arg0: i32, %arg1: memref<8x128xf32, #tpu.memory_space<vmem>>, %arg2: memref<4x128xf32, #tpu.memory_space<vmem>>, %arg3: memref<18x32xf32, #tpu.memory_space<vmem>>, %arg4: memref<18x128xf32, #tpu.memory_space<vmem>>) attributes {dimension_semantics = [#tpu.dimension_semantics<parallel>], iteration_bounds = array<i64: 1>, scalar_prefetch = 0 : i64, scratch_operands = 0 : i64, tpu.core_type = #tpu.core_type<tc>, window_params = [{transform_indices = @transform_0, window_bounds = array<i64: 8, 128>}, {transform_indices = @transform_1, window_bounds = array<i64: 4, 128>}, {pipeline_mode = #tpu.pipeline_mode<synchronous>, transform_indices = @transform_2, window_bounds = array<i64: 18, 32>}, {transform_indices = @transform_3, window_bounds = array<i64: 18, 128>}]} {
    %c0 = arith.constant 0 : index
    %c0_0 = arith.constant 0 : index
    %0 = vector.load %arg1[%c0, %c0_0] : memref<8x128xf32, #tpu.memory_space<vmem>>, vector<8x128xf32>
    %c0_1 = arith.constant 0 : index
    %c0_2 = arith.constant 0 : index
    %1 = vector.load %arg2[%c0_1, %c0_2] : memref<4x128xf32, #tpu.memory_space<vmem>>, vector<4x128xf32>
    %2 = vector.extract_strided_slice %1 {offsets = [0, 0], sizes = [1, 128], strides = [1, 1]} : vector<4x128xf32> to vector<1x128xf32>
    %3 = vector.broadcast %2 : vector<1x128xf32> to vector<8x128xf32>
    %4 = arith.mulf %0, %3 : vector<8x128xf32>
    %5 = vector.extract_strided_slice %1 {offsets = [1, 0], sizes = [1, 128], strides = [1, 1]} : vector<4x128xf32> to vector<1x128xf32>
    %6 = vector.broadcast %5 : vector<1x128xf32> to vector<8x128xf32>
    %7 = arith.mulf %0, %6 : vector<8x128xf32>
    %8 = vector.extract_strided_slice %1 {offsets = [2, 0], sizes = [1, 128], strides = [1, 1]} : vector<4x128xf32> to vector<1x128xf32>
    %9 = vector.broadcast %8 : vector<1x128xf32> to vector<8x128xf32>
    %10 = arith.mulf %0, %9 : vector<8x128xf32>
    %11 = vector.extract_strided_slice %1 {offsets = [3, 0], sizes = [1, 128], strides = [1, 1]} : vector<4x128xf32> to vector<1x128xf32>
    %12 = vector.broadcast %11 : vector<1x128xf32> to vector<8x128xf32>
    %13 = arith.mulf %0, %12 : vector<8x128xf32>
    %14 = tpu.concatenate %4, %7, %10, %13 in 0 : vector<8x128xf32>, vector<8x128xf32>, vector<8x128xf32>, vector<8x128xf32> -> vector<32x128xf32>
    %c0_3 = arith.constant 0 : index
    %c0_4 = arith.constant 0 : index
    %15 = vector.load %arg3[%c0_3, %c0_4] : memref<18x32xf32, #tpu.memory_space<vmem>>, vector<18x32xf32>
    %cst = arith.constant dense<0.000000e+00> : vector<18x128xf32>
    %16 = tpu.matmul %15, %14, %cst {dimension_numbers = #tpu.dot_dimension_numbers<[1], [0], [0], [1], [0, 0, 1, 1], [], []>} : vector<18x32xf32>, vector<32x128xf32>, vector<18x128xf32> -> vector<18x128xf32>
    %c0_5 = arith.constant 0 : index
    %c0_6 = arith.constant 0 : index
    %17 = vector.load %arg4[%c0_5, %c0_6] : memref<18x128xf32, #tpu.memory_space<vmem>>, vector<18x128xf32>
    tpu.vector_store %arg4[%c0_5, %c0_6], %16 {strides = array<i32>} : memref<18x128xf32, #tpu.memory_space<vmem>>, vector<18x128xf32>,
    return
  }
  func.func @transform_0(%arg0: i32) -> (i32, i32) {
    %c0_i32 = arith.constant 0 : i32
    %c0_i32_0 = arith.constant 0 : i32
    return %c0_i32, %arg0 : i32, i32
  }
  func.func @transform_1(%arg0: i32) -> (i32, i32) {
    %c0_i32 = arith.constant 0 : i32
    %c0_i32_0 = arith.constant 0 : i32
    return %c0_i32, %arg0 : i32, i32
  }
  func.func @transform_2(%arg0: i32) -> (i32, i32) {
    %c0_i32 = arith.constant 0 : i32
    %c0_i32_0 = arith.constant 0 : i32
    %c0_i32_1 = arith.constant 0 : i32
    return %c0_i32, %c0_i32_0 : i32, i32
  }
  func.func @transform_3(%arg0: i32) -> (i32, i32) {
    %c0_i32 = arith.constant 0 : i32
    %c0_i32_0 = arith.constant 0 : i32
    return %c0_i32, %arg0 : i32, i32
  }
}

</mosaic_0001>

<bundles_post_ra>
// kernel: tpu_custom_call.1
= control target key start
LH: loop header
LB: loop body
LE: loop exit
PB: predicated region body
PF: predicated region fallthrough
CT: control target
= control target key end

     0   :  { %8 = vsyncpa [#allocation3], 0  ;;  %s414_s0 = inlined_call_operand.hbm [shape: f32[8,128], index: 0, kind: input, shape index: {}]   ;;  %s415_s1 = inlined_call_operand.hbm [shape: f32[4,128], index: 1, kind: input, shape index: {}]   ;;  %s416_s2 = inlined_call_operand.hbm [shape: f32[18,32], index: 2, kind: input, shape index: {}]   ;;  %s417_s3 = inlined_call_operand.hbm [shape: f32[18,128], index: 3, kind: output, shape index: {}]  }
   0x1   :  { %9 = vsyncpa [#allocation6], 0 }
   0x2   :  { %10 = vsyncpa [#allocation4], 0  ;;  %s328_s12 = smov [#allocation5]   ;;  %s329_s14 = smov [#allocation2]  }
   0x3   :  { %s27_s13 = sshll.u32 %s328_s12, 4  ;;  %s17_s15 = sshll.u32 %s329_s14, 4  ;;  %s28_s13 = int_to_ptr.vmem [resolvable:$true] %s27_s13  ;;  %s18_s15 = int_to_ptr.vmem [resolvable:$true] %s17_s15 }
   0x4   :  { %s234_s18 = scalar_lea.hbm %s415_s1, 64 }
   0x5   :  { %p235_p0 = scmp.ne.s32.totalorder %s415_s1, %s234_s18  ;;  %p238_p1 = scmp.lt.u32.totalorder %s234_s18, %s415_s1 }
   0x7   :  { %p240_p2 = pnand %p238_p1, %p235_p0 }
   0x9   :  { %243 = shalt.err (!%p240_p2)
}
   0xa   :  { %s244_s23 = scalar_lea.vmem %s28_s13, 64  ;;  %p249_p4 = scmp.lt.s32.totalorder %s28_s13, %s28_s13 }
   0xb   :  { %p245_p3 = scmp.ne.s32.totalorder %s28_s13, %s244_s23  ;;  %p250_p5 = scmp.lt.s32.totalorder %s244_s23, %s244_s23 }
   0xd   :  { %p251_p6 = por %p250_p5, %p249_p4 }
   0xf   :  { %p252_p7 = pnand %p251_p6, %p245_p3 }
  0x11   :  { %255 = shalt.err (!%p252_p7)
}
  0x12   :  { %30 = dma.hbm_to_vmem [thread:$0]  %s415_s1, 64, %s28_s13, [#allocation6]  }
  0x13   :  { %s256_s28 = scalar_lea.hbm %s414_s0, 128 }
  0x14   :  { %p257_p8 = scmp.ne.s32.totalorder %s414_s0, %s256_s28  ;;  %p260_p9 = scmp.lt.u32.totalorder %s256_s28, %s414_s0 }
  0x16   :  { %p262_p10 = pnand %p260_p9, %p257_p8 }
  0x18   :  { %265 = shalt.err (!%p262_p10)
}
  0x19   :  { %s266_s6 = scalar_lea.vmem %s18_s15, 128  ;;  %p271_p12 = scmp.lt.s32.totalorder %s18_s15, %s18_s15 }
  0x1a   :  { %p267_p11 = scmp.ne.s32.totalorder %s18_s15, %s266_s6  ;;  %p272_p13 = scmp.lt.s32.totalorder %s266_s6, %s266_s6 }
  0x1c   :  { %p273_p0 = por %p272_p13, %p271_p12 }
  0x1e   :  { %p274_p1 = pnand %p273_p0, %p267_p11 }
  0x20   :  { %277 = shalt.err (!%p274_p1)
}
  0x21   :  { %20 = dma.hbm_to_vmem [thread:$0]  %s414_s0, 128, %s18_s15, [#allocation3]  }
  0x22   :  { %s330_s8 = smov [#allocation7]   ;;  %s278_s12 = scalar_lea.hbm %s416_s2, 384 }
  0x23   :  { %s36_s9 = sshll.u32 %s330_s8, 4  ;;  %p279_p2 = scmp.ne.s32.totalorder %s416_s2, %s278_s12  ;;  %s37_s9 = int_to_ptr.vmem [resolvable:$true] %s36_s9 }
  0x24   :  { %p282_p3 = scmp.lt.u32.totalorder %s278_s12, %s416_s2 }
  0x26   :  { %p284_p4 = pnand %p282_p3, %p279_p2 }
  0x28   :  { %287 = shalt.err (!%p284_p4)
}
  0x29   :  { %s288_s18 = scalar_lea.vmem %s37_s9, 384  ;;  %p293_p6 = scmp.lt.s32.totalorder %s37_s9, %s37_s9 }
  0x2a   :  { %p289_p5 = scmp.ne.s32.totalorder %s37_s9, %s288_s18  ;;  %p294_p7 = scmp.lt.s32.totalorder %s288_s18, %s288_s18 }
  0x2c   :  { %p295_p8 = por %p294_p7, %p293_p6 }
  0x2e   :  { %p296_p9 = pnand %p295_p8, %p289_p5 }
  0x30   :  { %299 = shalt.err (!%p296_p9)
}
  0x31   :  { %s331_s0 = smov 128   ;;  %s332_s15 = smov 8  }
  0x32   :  { %42 = dma.hbm_to_vmem [thread:$0]  %s416_s2, 384, %s37_s9, [#allocation6], %s331_s0, %s331_s0, %s332_s15  }
  0x33   :  { %322 = dma.done.wait [#allocation3], 128  }
  0x34   :  { %323 = vsyncadd [#allocation3], 4294967168 }
  0x35   :  { %324 = dma.done.wait [#allocation6], 448  }
  0x36   :  { %325 = vsyncadd [#allocation6], 4294966848  ;;  %v54_v0 = vlaneseq  ;;  %v333_v1 = vmov 0.0|0.0   ;;  %vm334_vm0 = vmmov 0   ;;  %v335_v3 = vmov 0.0   ;;  %v52_v8 = vld [vmem:[#allocation2] sm:$0xff] }
  0x37   :  { %221 = vmatprep.subr.bf16.mxu1 %v333_v1  ;;  %215 = vmatprep.subr.bf16.mxu0 %v333_v1  ;;  %v53_v9 = vld [vmem:[#allocation5] sm:$0xf]  ;;  %v75_v20 = vld [vmem:[#allocation7 + $0x8] sm:$0xff]  ;;  %vm77_vm1 = vcmask 261120   ;;  %v74_v21 = vld [vmem:[#allocation7] sm:$0xff]  ;;  %s336_s2 = smov [#allocation8]  }
  0x38   :  { %v55_v2 = vshrl.u32 %v54_v0, 7  ;;  %209 = vmatprep.mubr.msk.f32.mxu1 %vm334_vm0, %v335_v3  ;;  %206 = vmatprep.mubr.msk.f32.mxu0 %vm334_vm0, %v335_v3  ;;  %v76_v22 = vld [vmem:[#allocation7 + $0x10] sm:$0x3]  ;;  %s175_s21 = sshll.u32 %s336_s2, 4  ;;  %s176_s21 = int_to_ptr.vmem [resolvable:$true] %s175_s21 }
  0x39   :  { %s300_s22 = scalar_lea.vmem %s176_s21, 384  ;;  %p305_p11 = scmp.lt.s32.totalorder %s176_s21, %s176_s21 }
  0x3a   :  { %v56_v4 = vsub.s32 0, %v55_v2  ;;  %v61_v5 = vsub.s32 1, %v55_v2  ;;  %v66_v6 = vsub.s32 2, %v55_v2  ;;  %v71_v7 = vsub.s32 3, %v55_v2  ;;  %p301_p10 = scmp.ne.s32.totalorder %s176_s21, %s300_s22  ;;  %p306_p12 = scmp.lt.s32.totalorder %s300_s22, %s300_s22 }
  0x3c   :  { %v57_v10 = vrot.slane %v53_v9, %v56_v4  ;;  %v62_v11 = vrot.slane %v53_v9, %v61_v5  ;;  %v67_v12 = vrot.slane %v53_v9, %v66_v6  ;;  %v72_v13 = vrot.slane %v53_v9, %v71_v7  ;;  %p307_p13 = por %p306_p12, %p305_p11 }
  0x3e   :  { %v58_v14 = vmul.f32 %v57_v10, %v52_v8  ;;  %v63_v15 = vmul.f32 %v62_v11, %v52_v8  ;;  %v68_v16 = vmul.f32 %v67_v12, %v52_v8  ;;  %v73_v17 = vmul.f32 %v72_v13, %v52_v8  ;;  %p308_p0 = pnand %p307_p13, %p301_p10 }
  0x40   :  { %v216_v18 = vpack.c.bf16 %v63_v15, %v58_v14  ;;  %v219_v19 = vpack.c.bf16 %v73_v17, %v68_v16 }
  0x42   :  { %223 = vmatpush3.bf16.msra.mxu1 %v216_v18  ;;  %217 = vmatpush3.bf16.msra.mxu0 %v216_v18 }
  0x43   :  { %222 = vmatprep.subr.bf16.mxu1 %v333_v1  ;;  %218 = vmatprep.subr.bf16.mxu0 %v333_v1 }
  0x46   :  { %224 = vmatpush3.bf16.msra.mxu1 %v219_v19  ;;  %220 = vmatpush3.bf16.msra.mxu0 %v219_v19 }
  0x49   :  { %210 = vmatmul.mubr.msk.f32.vlgmr.msra.gmra.mrb[0].mxu1 %vm77_vm1, %v75_v20  ;;  %207 = vmatmul.mubr.msk.f32.vlgmr.msra.gmra.mrb[0].mxu0 %vm77_vm1, %v74_v21 }
  0x4a   :  { %212 = vmatprep.mubr.msk.f32.mxu1 %vm334_vm0, %v335_v3 }
  0x4d   :  { %213 = vmatmul.mubr.msk.f32.gmra.mrb[2].mxu1 %vm77_vm1, %v76_v22 }
 0x11c   :  { %v158_v23 = vpop.f32.mrb[0].mxu1  ;;  %v153_v24 = vpop.f32.mrb[0].mxu0 }
 0x11d   :  { %168 = vst [vmem:[#allocation8 + $0x8] sm:$0xff] %v158_v23  ;;  %v211_v25 = vpop.f32.mrb[1].mxu1  ;;  %167 = vst [vmem:[#allocation8] sm:$0xff] %v153_v24  ;;  %v208_v26 = vpop.f32.mrb[1].mxu0 }
 0x120   :  { %v163_v27 = vpop.f32.mrb[2].mxu1 }
 0x121   :  { %169 = vst [vmem:[#allocation8 + $0x10] sm:$0x3] %v163_v27  ;;  %v214_v28 = vpop.f32.mrb[3].mxu1 }
 0x122   :  { %311 = shalt.err (!%p308_p0)
}
 0x123   :  { %s312_s25 = scalar_lea.hbm %s417_s3, 384 }
 0x124   :  { %p313_p1 = scmp.ne.s32.totalorder %s417_s3, %s312_s25  ;;  %p316_p2 = scmp.lt.u32.totalorder %s312_s25, %s417_s3 }
 0x126   :  { %p318_p3 = pnand %p316_p2, %p313_p1 }
 0x128   :  { %321 = shalt.err (!%p318_p3)
}
 0x129   :  { %181 = dma.vmem_to_hbm [thread:$0]  %s176_s21, 384, %s417_s3, [#allocation4], %s331_s0, %s331_s0, %s332_s15  }
 0x12a   :  { %326 = dma.done.wait [#allocation4], 384  }
 0x12b   :  { %327 = vsyncadd [#allocation4], 4294966912 }
 0x12c   :  { %185 = vsyncpa [#allocation3], 1 }
 0x12d   :  { %186 = vsyncpa [#allocation6], 1 }
 0x12e   :  { %187 = vsyncpa [#allocation4], 1 }

</bundles_post_ra>
